<compile_context>
chip_gen: v5e
topology: v5e:2x2
jax: 0.10.0
libtpu: 0.0.40
codegen_flags: <defaults>
</compile_context>

<pallas_src>
import functools

import jax
import jax.numpy as jnp
from jax import lax
from jax.experimental import pallas as pl
from jax.experimental.pallas import tpu as pltpu

LANE = 128
L_TILE_CAP = 8192           # max lane columns per grid step (multiple of 128)


def _cdiv(a, b):
    return -(-a // b)


@functools.lru_cache(maxsize=None)
def _roll_matches_jnp():
    """True if pltpu.roll(x, s, axis) == jnp.roll(x, s, axis) under this Mosaic lowering."""
    def k(x_ref, o_ref):
        o_ref[...] = pltpu.roll(x_ref[...], 1, 1)

    x = jnp.broadcast_to(jnp.arange(128, dtype=jnp.float32), (8, 128))
    y = pl.pallas_call(k, out_shape=jax.ShapeDtypeStruct((8, 128), jnp.float32))(x)
    return bool(jnp.allclose(y[0], jnp.roll(x[0], 1)))


def _make_kernel(l_tile, w2c, roll_like_jnp):
    # (phase bit, pooled-coordinate shift) for original-pixel offsets t = -1, 0, 1, 2:
    # original row/col 2*p + t == 2*(p + dp) + pr with (pr, dp) = R[t + 1].
    R = ((1, -1), (0, 0), (1, 0), (0, 1))

    def kernel(x4_ref, mask_ref, w16_ref, b1_ref, w2_ref, b2_ref, o_ref, p16_ref):
        # x4_ref  : (4, LT)   phase planes; row = (i%2)*2 + (j%2),
        #                     lane = flattened (image, pooled row p, pooled col q).
        # mask_ref: (4, LT)   0/1 edge masks [p>0, p<H2-1, q>0, q<W2-1]  (conv zero padding).
        # w16_ref : (64, 16)  conv weights; row = pool_phase*16 + out_channel, col = plane id.
        # b1_ref  : (16, 1)   conv bias.   w2_ref: (4, 16) deconv weight, row = di*2 + dj.
        # b2_ref  : (1, 1)    deconv bias (SMEM scalar).
        # o_ref   : (4, LT)   sigmoid(decoder), lane-dense.
        # p16_ref : (16, LT)  VMEM scratch: the 16 shifted/masked planes (in-kernel im2col).
        x4 = x4_ref[...]
        mk = mask_ref[...]

        rolled = {0: x4}

        def shifted(sh):            # out[:, i] = x4[:, (i + sh) % LT]
            if sh not in rolled:
                amt = (-sh) % l_tile if roll_like_jnp else sh % l_tile
                rolled[sh] = pltpu.roll(x4, amt, 1)
            return rolled[sh]

        # In-kernel im2col: 16 planes, each a lane-rotated phase row with image-edge masking.
        # Rolls/mask-muls ride the otherwise idle XLU/VPU slots; the kernel stays HBM-bound.
        for a, (pr, dp) in enumerate(R):
            for b, (pc, dq) in enumerate(R):
                v = shifted(dp * w2c + dq)[pr * 2 + pc: pr * 2 + pc + 1, :]
                if dp == -1:
                    v = v * mk[0:1, :]
                if dp == 1:
                    v = v * mk[1:2, :]
                if dq == -1:
                    v = v * mk[2:3, :]
                if dq == 1:
                    v = v * mk[3:4, :]
                p16_ref[a * 4 + b: a * 4 + b + 1, :] = v

        # Conv2d at all four 2x2 pool-window positions in ONE MXU matmul: (64,16)@(16,LT).
        z = jnp.dot(w16_ref[...], p16_ref[...], preferred_element_type=jnp.float32)

        # MaxPool2d(2): max over the four 16-row pool-phase groups (sublane-aligned slices).
        zmax = jnp.maximum(jnp.maximum(z[0:16, :], z[16:32, :]),
                           jnp.maximum(z[32:48, :], z[48:64, :]))

        # Bias + ReLU hoisted past the max (exact: shared bias, monotone max).
        pooled = jnp.maximum(zmax + b1_ref[...], 0.0)

        # ConvTranspose2d(16,1,2,s=2): one (4,16)@(16,LT) matmul + scalar bias from SMEM.
        d = jnp.dot(w2_ref[...], pooled, preferred_element_type=jnp.float32) + b2_ref[0, 0]

        # Exact sigmoid (exp goes to the EUP slot; exact divide keeps the 1e-5 check).
        o_ref[...] = 1.0 / (1.0 + jnp.exp(-d))

    return kernel


@functools.partial(jax.jit, static_argnums=(5,))
def _forward_impl(x, w1, b1, w2, b2, roll_like_jnp):
    N, C, H, W = x.shape
    assert C == 1 and H % 2 == 0 and W % 2 == 0
    H2, W2 = H // 2, W // 2
    P = H2 * W2

    # ---- lane tiling: whole-image-aligned tiles, multiple of 128 lanes ----
    P_pad = _cdiv(P, LANE) * LANE                          # per-image lane block
    imgs_per_tile = max(1, min(N, L_TILE_CAP // P_pad))
    grid_l = _cdiv(N, imgs_per_tile)
    if grid_l < 2 and N >= 2:                              # v7x megacore: give both cores work
        imgs_per_tile = _cdiv(N, 2)
        grid_l = _cdiv(N, imgs_per_tile)
    N_pad = grid_l * imgs_per_tile
    L_TILE = imgs_per_tile * P_pad
    L_pad = N_pad * P_pad
    # TODO(synk): for P_pad > L_TILE_CAP (very large images) add sub-image lane chunking.

    # ---- host glue (x-sized, one cheap pass): 2x2 phase de-interleave of x ----
    # X4[(i%2)*2 + (j%2), n, p*W2 + q] = x[n, 2p + i%2, 2q + j%2]
    x4 = x[:, 0].reshape(N, H2, 2, W2, 2).transpose(2, 4, 0, 1, 3).reshape(4, N, P)
    x4 = jnp.pad(x4, ((0, 0), (0, N_pad - N), (0, P_pad - P))).reshape(4, L_pad)
    # TODO(synk): fold this de-interleave into the kernel too (stride-2 lane gathers on raw x).

    # ---- image-edge masks (conv zero padding); identical for every tile, stay VMEM-resident ----
    idx = jnp.arange(P_pad, dtype=jnp.int32)
    pp, qq = idx // W2, idx % W2
    masks = jnp.stack([pp >= 1, pp <= H2 - 2, qq >= 1, qq <= W2 - 2]).astype(jnp.float32)
    masks = jnp.tile(masks, (1, imgs_per_tile))                        # (4, L_TILE)

    # ---- weights in kernel layout ----
    w1r = w1[:, 0]                                                     # (16, 3, 3)
    cols = []
    for a in range(4):                     # original-row offset t = a - 1
        for b in range(4):                 # original-col offset u = b - 1
            blocks = []
            for ri in range(2):
                for rj in range(2):
                    dy, dx = a - ri, b - rj
                    if 0 <= dy <= 2 and 0 <= dx <= 2:
                        blocks.append(w1r[:, dy, dx])
                    else:
                        blocks.append(jnp.zeros((16,), w1.dtype))
            cols.append(jnp.concatenate(blocks))                       # (64,)
    w16 = jnp.stack(cols, axis=1)                                      # (64, 16)
    b1r = b1.reshape(16, 1)
    w2r = w2.reshape(16, 4).T                                          # (4, 16), row = di*2+dj
    b2r = b2.reshape(1, 1)

    kernel = _make_kernel(L_TILE, W2, roll_like_jnp)
    out = pl.pallas_call(
        kernel,
        out_shape=jax.ShapeDtypeStruct((4, L_pad), jnp.float32),
        grid=(grid_l,),
        in_specs=[
            pl.BlockSpec((4, L_TILE), lambda i: (0, i)),               # x4: streamed per tile
            pl.BlockSpec((4, L_TILE), lambda i: (0, 0)),               # masks: resident
            pl.BlockSpec((64, 16), lambda i: (0, 0)),
            pl.BlockSpec((16, 1), lambda i: (0, 0)),
            pl.BlockSpec((4, 16), lambda i: (0, 0)),
            pl.BlockSpec(memory_space=pltpu.MemorySpace.SMEM),         # b2 scalar
        ],
        out_specs=pl.BlockSpec((4, L_TILE), lambda i: (0, i)),
        scratch_shapes=[pltpu.VMEM((16, L_TILE), jnp.float32)],
        compiler_params=pltpu.CompilerParams(dimension_semantics=("parallel",)),
    )(x4, masks, w16, b1r, w2r, b2r)

    # ---- host glue: (4, L_pad) -> (N,1,H,W);  y[n, 2p+di, 2q+dj] = out[di*2+dj, n, p*W2+q] ----
    out = out.reshape(2, 2, N_pad, P_pad)[:, :, :N, :P].reshape(2, 2, N, H2, W2)
    return out.transpose(2, 3, 0, 4, 1).reshape(N, 1, H, W)


def mediator_forward(x, w1, b1, w2, b2):
    """x: (N,1,H,W) float32 (NCHW, like PyTorch). Returns (N,1,H,W)."""
    return _forward_impl(x, w1, b1, w2, b2, _roll_matches_jnp())


def mediator_reference(x, w1, b1, w2, b2):
    """Pure-JAX reference matching the PyTorch forward exactly."""
    N = x.shape[0]
    y = lax.conv_general_dilated(x, w1, (1, 1), ((1, 1), (1, 1)),
                                 dimension_numbers=('NCHW', 'OIHW', 'NCHW'))
    y = jnp.maximum(y + b1.reshape(1, 16, 1, 1), 0.0)
    y = lax.reduce_window(y, -jnp.inf, lax.max, (1, 1, 2, 2), (1, 1, 2, 2), 'VALID')
    # ConvTranspose2d(16,1,2,stride=2): out[n,0,2p+di,2q+dj] = sum_c y[n,c,p,q]*w2[c,0,di,dj] + b2
    d = jnp.einsum('ncpq,cij->npiqj', y, w2[:, 0])
    H2, W2 = y.shape[2], y.shape[3]
    d = d.reshape(N, 1, 2 * H2, 2 * W2) + b2.reshape(1, 1, 1, 1)
    return jax.nn.sigmoid(d)


if __name__ == "__main__":
    key = jax.random.PRNGKey(0)
    kx, k1, k2, k3, k4 = jax.random.split(key, 5)

    # small shapes consistent with the module: batch=2, 1 channel, 16x16 spatial
    x = jax.random.normal(kx, (2, 1, 16, 16), jnp.float32)
    # deterministic synthetic params (same shapes as the PyTorch module's parameters)
    w1 = jax.random.normal(k1, (16, 1, 3, 3), jnp.float32) * 0.3   # Conv2d weight
    b1 = jax.random.normal(k2, (16,), jnp.float32) * 0.1           # Conv2d bias
    w2 = jax.random.normal(k3, (16, 1, 2, 2), jnp.float32) * 0.3   # ConvTranspose2d weight
    b2 = jax.random.normal(k4, (1,), jnp.float32) * 0.1            # ConvTranspose2d bias

    y = jax.block_until_ready(mediator_forward(x, w1, b1, w2, b2))
    y_ref = mediator_reference(x, w1, b1, w2, b2)

    assert y.shape == (2, 1, 16, 16), y.shape
    err = float(jnp.max(jnp.abs(y - y_ref)))
    assert jnp.allclose(y, y_ref, atol=1e-5, rtol=1e-5), err
    print("KERNEL_OK")
</pallas_src>

<mosaic_0001>
module attributes {stable_mosaic.version = 11 : i64} {
  func.func @k(%arg0: memref<8x128xf32, #tpu.memory_space<vmem>>, %arg1: memref<8x128xf32, #tpu.memory_space<vmem>>) attributes {dimension_semantics = [], scalar_prefetch = 0 : i64, scratch_operands = 0 : i64, tpu.core_type = #tpu.core_type<tc>} {
    %c0 = arith.constant 0 : index
    %c0_0 = arith.constant 0 : index
    %0 = vector.load %arg0[%c0, %c0_0] : memref<8x128xf32, #tpu.memory_space<vmem>>, vector<8x128xf32>
    %c1_i32 = arith.constant 1 : i32
    %1 = tpu.dynamic_rotate %0 by %c1_i32 dim 1 : vector<8x128xf32>, i32 -> vector<8x128xf32>
    %c0_1 = arith.constant 0 : index
    %c0_2 = arith.constant 0 : index
    %2 = vector.load %arg1[%c0_1, %c0_2] : memref<8x128xf32, #tpu.memory_space<vmem>>, vector<8x128xf32>
    tpu.vector_store %arg1[%c0_1, %c0_2], %1 {strides = array<i32>} : memref<8x128xf32, #tpu.memory_space<vmem>>, vector<8x128xf32>,
    return
  }
}

</mosaic_0001>

<bundles_post_ra>
// kernel: tpu_custom_call.1
= control target key start
LH: loop header
LB: loop body
LE: loop exit
PB: predicated region body
PF: predicated region fallthrough
CT: control target
= control target key end

     0   :  { %6 = vsyncpa [#allocation3], 0  ;;  %s118_s0 = inlined_call_operand.hbm [shape: f32[8,128], index: 0, kind: input, shape index: {}]   ;;  %s119_s1 = inlined_call_operand.hbm [shape: f32[8,128], index: 1, kind: output, shape index: {}]  }
   0x1   :  { %7 = vsyncpa [#allocation4], 0  ;;  %s13_s8 = sshll.u32 %s118_s0, 4  ;;  %s99_s9 = smov [#allocation2]   ;;  %s14_s8 = int_to_ptr.hbm [resolvable:$true] %s13_s8 }
   0x2   :  { %s15_s10 = sshll.u32 %s99_s9, 4  ;;  %s16_s10 = int_to_ptr.vmem [resolvable:$true] %s15_s10 }
   0x3   :  { %18 = dma.hbm_to_vmem [thread:$0]  %s14_s8, 128, %s16_s10, [#allocation3]  }
   0x4   :  { %95 = dma.done.wait [#allocation3], 128  }
   0x5   :  { %96 = vsyncadd [#allocation3], 4294967168  ;;  %v23_v0 = vld [vmem:[#allocation2] sm:$0xff]  ;;  %s100_s11 = smov 1   ;;  %s101_s12 = smov [#allocation5]  }
   0x6   :  { %24 = vrot.lane.b32.xlu0 %v23_v0, %s100_s11  ;;  %s32_s13 = sshll.u32 %s101_s12, 4  ;;  %s34_s16 = sshll.u32 %s119_s1, 4  ;;  %s33_s13 = int_to_ptr.vmem [resolvable:$true] %s32_s13  ;;  %s35_s16 = int_to_ptr.hbm [resolvable:$true] %s34_s16 }
  0x78   :  { %v25_v1 = vpop.permute.xlu0 %24 }
  0x79   :  { %26 = vst [vmem:[#allocation5] sm:$0xff] %v25_v1 }
  0x7a   :  { %37 = dma.vmem_to_hbm [thread:$0]  %s33_s13, 128, %s35_s16, [#allocation4]  }
  0x7b   :  { %97 = dma.done.wait [#allocation4], 128  }
  0x7c   :  { %98 = vsyncadd [#allocation4], 4294967168 }
  0x7d   :  { %42 = vsyncpa [#allocation3], 1 }
  0x7e   :  { %43 = vsyncpa [#allocation4], 1 }

</bundles_post_ra>
